<compile_context>
chip_gen: v5e
topology: v5e:2x2
jax: 0.10.0
libtpu: 0.0.40
codegen_flags: <defaults>
</compile_context>

<pallas_src>
import functools

import jax
import jax.numpy as jnp
from jax.experimental import pallas as pl
from jax.experimental.pallas import tpu as pltpu


# ---------------------------------------------------------------------------
# Tuning helpers
# ---------------------------------------------------------------------------
def _block_bytes() -> int:
    """~8 MiB streamed blocks on v7x; ~4 MiB on v5e/v6e (already <4% step
    overhead at their HBM bandwidths, bigger buys nothing)."""
    try:
        kind = jax.devices()[0].device_kind.lower()
    except Exception:
        kind = ""
    return (8 if "v7" in kind else 4) * 1024 * 1024


def _vmem_limit(per_block_bytes: int) -> int:
    """2x double-buffered input + 2x double-buffered output + headroom,
    kept well under v7x's 64 MiB physical VMEM."""
    need = 4 * per_block_bytes + 4 * 1024 * 1024
    return int(min(max(need, 8 * 1024 * 1024), 60 * 1024 * 1024))


# ---------------------------------------------------------------------------
# Kernels
# ---------------------------------------------------------------------------
def _sigmoid_abs(x):
    # sigmoid(|x|) = 1 / (1 + exp(-|x|)).  exp and the reciprocal both run on
    # the EUP, so the VPU only sees abs / add / select / mul per element.
    e = jnp.exp(-jnp.abs(x))
    return pl.reciprocal(1.0 + e, approx=False)


def _flow_bound_kernel(flow_ref, cap_ref, out_ref):
    """General (TB, TN) block; capacities arrive as a (TB, 2) VMEM tile."""
    flow = flow_ref[...].astype(jnp.float32)             # (TB, TN)
    imp = cap_ref[:, 0:1].astype(jnp.float32)             # (TB, 1) import cap
    exp_cap = cap_ref[:, 1:2].astype(jnp.float32)         # (TB, 1) export cap
    s = _sigmoid_abs(flow)
    out_ref[...] = (s * jnp.where(flow < 0, imp, exp_cap)).astype(out_ref.dtype)


def _flow_bound_dense_kernel(n_r_tiles, flow_ref, cap_ref, out_ref):
    """Sublane-dense path: one batch row reshaped to (TR, 128) blocks; the
    flat grid index encodes (batch, row-tile).  Capacities read from SMEM."""
    b = pl.program_id(0) // n_r_tiles                     # batch row of block
    flow = flow_ref[...].astype(jnp.float32)              # (TR, 128)
    imp = cap_ref[b, 0].astype(jnp.float32)                # scalar (SMEM)
    exp_cap = cap_ref[b, 1].astype(jnp.float32)            # scalar (SMEM)
    s = _sigmoid_abs(flow)
    out_ref[...] = (s * jnp.where(flow < 0, imp, exp_cap)).astype(out_ref.dtype)


# ---------------------------------------------------------------------------
# Wrappers
# ---------------------------------------------------------------------------
def _flow_bound_general(flow, flow_capacity):
    B, N = flow.shape
    itemsize = jnp.dtype(flow.dtype).itemsize
    block_elems = _block_bytes() // itemsize

    # Prefer a short batch tile and a wide, lane-dense TN (lane-dense output
    # is the biggest store/DMA lever; also only a few (TB,1)->lane splats).
    TB = B if B <= 64 else 64                              # full dim or mult. of 8
    tn = ((block_elems // TB) // 128) * 128
    TN = N if (tn == 0 or tn >= N) else tn                 # mult. of 128 or full N
    grid = (pl.cdiv(B, TB), pl.cdiv(N, TN))

    return pl.pallas_call(
        _flow_bound_kernel,
        out_shape=jax.ShapeDtypeStruct((B, N), flow.dtype),
        grid_spec=pltpu.PrefetchScalarGridSpec(
            num_scalar_prefetch=0,
            grid=grid,
            in_specs=[
                pl.BlockSpec((TB, TN), lambda i, j: (i, j)),
                # tiny per-batch capacity tile; constant along the lane axis
                pl.BlockSpec((TB, 2), lambda i, j: (i, 0)),
            ],
            out_specs=pl.BlockSpec((TB, TN), lambda i, j: (i, j)),
        ),
        compiler_params=pltpu.CompilerParams(
            dimension_semantics=("parallel", "parallel"),
            vmem_limit_bytes=_vmem_limit(TB * TN * itemsize)),
    )(flow, flow_capacity)


def _flow_bound_dense(flow, flow_capacity):
    """B < 8: pack each row's N elements into (R, 128) so sublanes are full."""
    B, N = flow.shape
    itemsize = jnp.dtype(flow.dtype).itemsize
    R = N // 128
    flow3 = flow.reshape(B, R, 128)

    tr_cap = max((_block_bytes() // itemsize) // 128, 8)   # rows per block
    TR = R if R <= tr_cap else tr_cap                      # full dim or mult. of 8
    n_r = pl.cdiv(R, TR)                                   # static Python int
    grid = (B * n_r,)                                      # flat 1-D grid ->
                                                           # balanced megacore split

    out = pl.pallas_call(
        functools.partial(_flow_bound_dense_kernel, n_r),
        out_shape=jax.ShapeDtypeStruct((B, R, 128), flow.dtype),
        grid_spec=pltpu.PrefetchScalarGridSpec(
            num_scalar_prefetch=0,
            grid=grid,
            in_specs=[
                pl.BlockSpec((None, TR, 128),
                             lambda i: (i // n_r, i % n_r, 0)),
                # whole (B, 2) capacity table lives in SMEM; read as scalars
                pl.BlockSpec(memory_space=pltpu.MemorySpace.SMEM),
            ],
            out_specs=pl.BlockSpec((None, TR, 128),
                                   lambda i: (i // n_r, i % n_r, 0)),
        ),
        compiler_params=pltpu.CompilerParams(
            dimension_semantics=("parallel",),
            vmem_limit_bytes=_vmem_limit(TR * 128 * itemsize)),
    )(flow3, flow_capacity)
    return out.reshape(B, N)


def flow_bound(flow: jax.Array, flow_capacity: jax.Array,
               eps: float = 1e-8) -> jax.Array:
    """flow: (B, N); flow_capacity: (B, 2) -> (B, N).

    eps is accepted for parity with the PyTorch module but is unused in its
    forward pass.
    """
    B, N = flow.shape
    assert flow_capacity.shape == (B, 2)
    if B < 8 and N % 128 == 0 and (N // 128) >= 8:
        return _flow_bound_dense(flow, flow_capacity)
    return _flow_bound_general(flow, flow_capacity)


def flow_bound_ref(flow, flow_capacity):
    imp = flow_capacity[:, 0:1]
    exp = flow_capacity[:, 1:2]
    return jnp.where(flow < 0,
                     jax.nn.sigmoid(-flow) * imp,
                     jax.nn.sigmoid(flow) * exp)


if __name__ == "__main__":
    key = jax.random.PRNGKey(0)
    k1, k2, k3, k4 = jax.random.split(key, 4)

    # Small demo shape implied by the module: batch of 2, 128 "lines".
    B, N = 2, 128
    flow = jax.random.normal(k1, (B, N), dtype=jnp.float32) * 3.0
    flow_capacity = jnp.abs(jax.random.normal(k2, (B, 2), dtype=jnp.float32)) + 0.5

    out = flow_bound(flow, flow_capacity)
    jax.block_until_ready(out)
    ref = flow_bound_ref(flow, flow_capacity)
    assert out.shape == (B, N)
    assert jnp.allclose(out, ref, atol=1e-5, rtol=1e-5), "mismatch (general path)"

    # Also exercise the sublane-dense (B < 8, N >= 1024) path.
    B2, N2 = 4, 1024
    flow2 = jax.random.normal(k3, (B2, N2), dtype=jnp.float32) * 3.0
    cap2 = jnp.abs(jax.random.normal(k4, (B2, 2), dtype=jnp.float32)) + 0.5
    out2 = flow_bound(flow2, cap2)
    jax.block_until_ready(out2)
    ref2 = flow_bound_ref(flow2, cap2)
    assert jnp.allclose(out2, ref2, atol=1e-5, rtol=1e-5), "mismatch (dense path)"

    print("KERNEL_OK")
</pallas_src>

<mosaic_0001>
module attributes {stable_mosaic.version = 11 : i64} {
  func.func @_flow_bound_kernel(%arg0: i32, %arg1: i32, %arg2: memref<2x128xf32, #tpu.memory_space<vmem>>, %arg3: memref<2x2xf32, #tpu.memory_space<vmem>>, %arg4: memref<2x128xf32, #tpu.memory_space<vmem>>) attributes {dimension_semantics = [#tpu.dimension_semantics<parallel>, #tpu.dimension_semantics<parallel>], iteration_bounds = array<i64: 1, 1>, scalar_prefetch = 0 : i64, scratch_operands = 0 : i64, tpu.core_type = #tpu.core_type<tc>, window_params = [{transform_indices = @transform_0, window_bounds = array<i64: 2, 128>}, {transform_indices = @transform_1, window_bounds = array<i64: 2, 2>}, {transform_indices = @transform_2, window_bounds = array<i64: 2, 128>}]} {
    %c0 = arith.constant 0 : index
    %c0_0 = arith.constant 0 : index
    %0 = vector.load %arg2[%c0, %c0_0] : memref<2x128xf32, #tpu.memory_space<vmem>>, vector<2x128xf32>
    %c0_1 = arith.constant 0 : index
    %c0_2 = arith.constant 0 : index
    %1 = vector.load %arg3[%c0_1, %c0_2] : memref<2x2xf32, #tpu.memory_space<vmem>>, vector<2x1xf32>
    %c0_3 = arith.constant 0 : index
    %c1 = arith.constant 1 : index
    %2 = vector.load %arg3[%c0_3, %c1] : memref<2x2xf32, #tpu.memory_space<vmem>>, vector<2x1xf32>
    %3 = math.absf %0 : vector<2x128xf32>
    %cst = arith.constant 0.000000e+00 : f32
    %4 = vector.broadcast %cst : f32 to vector<2x128xf32>
    %5 = arith.subf %4, %3 : vector<2x128xf32>
    %6 = math.exp %5 : vector<2x128xf32>
    %cst_4 = arith.constant 1.000000e+00 : f32
    %7 = vector.broadcast %cst_4 : f32 to vector<2x128xf32>
    %8 = arith.addf %7, %6 : vector<2x128xf32>
    %9 = tpu.reciprocal %8 : vector<2x128xf32> -> vector<2x128xf32>
    %cst_5 = arith.constant 0.000000e+00 : f32
    %10 = vector.broadcast %cst_5 : f32 to vector<2x128xf32>
    %11 = arith.cmpf olt, %0, %10 : vector<2x128xf32>
    %12 = vector.shape_cast %1 : vector<2x1xf32> to vector<2x1xf32>
    %13 = vector.broadcast %12 : vector<2x1xf32> to vector<2x128xf32>
    %14 = vector.shape_cast %2 : vector<2x1xf32> to vector<2x1xf32>
    %15 = vector.broadcast %14 : vector<2x1xf32> to vector<2x128xf32>
    %16 = arith.select %11, %13, %15 : vector<2x128xi1>, vector<2x128xf32>
    %17 = arith.mulf %9, %16 : vector<2x128xf32>
    %c0_6 = arith.constant 0 : index
    %c0_7 = arith.constant 0 : index
    %18 = vector.load %arg4[%c0_6, %c0_7] : memref<2x128xf32, #tpu.memory_space<vmem>>, vector<2x128xf32>
    tpu.vector_store %arg4[%c0_6, %c0_7], %17 {strides = array<i32>} : memref<2x128xf32, #tpu.memory_space<vmem>>, vector<2x128xf32>,
    return
  }
  func.func @transform_0(%arg0: i32, %arg1: i32) -> (i32, i32) {
    %c0_i32 = arith.constant 0 : i32
    return %arg0, %arg1 : i32, i32
  }
  func.func @transform_1(%arg0: i32, %arg1: i32) -> (i32, i32) {
    %c0_i32 = arith.constant 0 : i32
    %c0_i32_0 = arith.constant 0 : i32
    return %arg0, %c0_i32 : i32, i32
  }
  func.func @transform_2(%arg0: i32, %arg1: i32) -> (i32, i32) {
    %c0_i32 = arith.constant 0 : i32
    return %arg0, %arg1 : i32, i32
  }
}

</mosaic_0001>

<bundles_post_ra>
// kernel: tpu_custom_call.1
= control target key start
LH: loop header
LB: loop body
LE: loop exit
PB: predicated region body
PF: predicated region fallthrough
CT: control target
= control target key end

     0   :  { %7 = vsyncpa [#allocation3], 0  ;;  %s210_s0 = inlined_call_operand.hbm [shape: f32[2,128], index: 0, kind: input, shape index: {}]   ;;  %s211_s1 = inlined_call_operand.hbm [shape: f32[2,2], index: 1, kind: input, shape index: {}]   ;;  %s212_s2 = inlined_call_operand.hbm [shape: f32[2,128], index: 2, kind: output, shape index: {}]  }
   0x1   :  { %8 = vsyncpa [#allocation6], 0 }
   0x2   :  { %9 = vsyncpa [#allocation4], 0  ;;  %s15_s11 = sshll.u32 %s210_s0, 4  ;;  %s181_s12 = smov [#allocation2]   ;;  %s16_s11 = int_to_ptr.hbm [resolvable:$true] %s15_s11 }
   0x3   :  { %s17_s13 = sshll.u32 %s181_s12, 4  ;;  %s26_s16 = sshll.u32 %s211_s1, 4  ;;  %s18_s13 = int_to_ptr.vmem [resolvable:$true] %s17_s13  ;;  %s27_s16 = int_to_ptr.hbm [resolvable:$true] %s26_s16 }
   0x4   :  { %20 = dma.hbm_to_vmem [thread:$0]  %s16_s11, 32, %s18_s13, [#allocation3]  }
   0x5   :  { %s182_s17 = smov [#allocation5]  }
   0x6   :  { %s28_s18 = sshll.u32 %s182_s17, 4  ;;  %s29_s18 = int_to_ptr.vmem [resolvable:$true] %s28_s18 }
   0x7   :  { %31 = dma.hbm_to_vmem [thread:$0]  %s27_s16, 32, %s29_s18, [#allocation6]  }
   0x8   :  { %175 = dma.done.wait [#allocation3], 32  }
   0x9   :  { %176 = vsyncadd [#allocation3], 4294967264 }
   0xa   :  { %177 = dma.done.wait [#allocation6], 32  }
   0xb   :  { %178 = vsyncadd [#allocation6], 4294967264  ;;  %v183_v0 = vmov 0   ;;  %v41_v1 = vld [vmem:[#allocation5] sm:$0x3]  ;;  %v184_v2 = vmov 1  }
   0xc   :  { %97 = vset.pattern.permute.xlu0 %v183_v0  ;;  %v40_v3 = vld [vmem:[#allocation2] sm:$0x3]  ;;  %s185_s0 = smov [#allocation7]   ;;  %s81_s21 = sshll.u32 %s212_s2, 4  ;;  %s82_s21 = int_to_ptr.hbm [resolvable:$true] %s81_s21 }
   0xd   :  { %64 = vperm.xlu0 %97, %v41_v1   ;;  %v42_v4 = vand.u32 2147483647, %v40_v3  ;;  %vm61_vm4 = vcmp.lt.f32.partialorder %v40_v3, 0.0  ;;  %s79_s1 = sshll.u32 %s185_s0, 4  ;;  %s80_s1 = int_to_ptr.vmem [resolvable:$true] %s79_s1 }
   0xf   :  { %v43_v5 = vsub.f32 0.0, %v42_v4 }
  0x11   :  { %v44_v6 = vmul.f32 1.442695, %v43_v5 }
  0x13   :  { %99 = vpow2.f32 %v44_v6 }
  0x15   :  { %98 = vset.pattern.permute.xlu0 %v184_v2 }
  0x16   :  { %68 = vperm.xlu0 %98, %v41_v1  }
  0x19   :  { %v100_v7 = vpop.eup %99 }
  0x1a   :  { %v46_v8 = vadd.f32 1.0, %v100_v7 }
  0x1c   :  { %101 = vrcp.f32 %v46_v8  ;;  %vm52_vm0 = vweird.f32 %v46_v8  ;;  %v58_v14 = vand.u32 2147483648, %v46_v8  ;;  %v56_v16 = vand.u32 2147483647, %v46_v8 }
  0x1e   :  { %v59_v17 = vor.u32 1.1754944e-38, %v58_v14  ;;  %vm57_vm3 = vcmp.eq.f32.partialorder %v56_v16, 8.507059e+37 }
  0x22   :  { %v102_v9 = vpop.eup %101 }
  0x23   :  { %v48_v10 = vmul.f32 %v102_v9, %v46_v8  ;;  %vm53_vm1 = vweird.f32 %v102_v9 }
  0x24   :  { %vm54_vm2 = vmor %vm52_vm0, %vm53_vm1 }
  0x25   :  { %v49_v11 = vsub.f32 1.0, %v48_v10 }
  0x27   :  { %v50_v12 = vmul.f32 %v102_v9, %v49_v11 }
  0x29   :  { %v51_v15 = vadd.f32 %v102_v9, %v50_v12 }
  0x2b   :  { %v55_v18 = vsel %vm54_vm2, %v102_v9, %v51_v15 }
  0x2c   :  { %v60_v19 = vsel %vm57_vm3, %v59_v17, %v55_v18 }
  0x7f   :  { %v65_v13 = vpop.permute.xlu0 %64 }
  0x88   :  { %v69_v20 = vpop.permute.xlu0 %68 }
  0x89   :  { %v71_v21 = vsel %vm61_vm4, %v65_v13, %v69_v20 }
  0x8a   :  { %v72_v22 = vmul.f32 %v71_v21, %v60_v19 }
  0x8c   :  { %73 = vst [vmem:[#allocation7] sm:$0x3] %v72_v22 }
  0x8d   :  { %84 = dma.vmem_to_hbm [thread:$0]  %s80_s1, 32, %s82_s21, [#allocation4]  }
  0x8e   :  { %179 = dma.done.wait [#allocation4], 32  }
  0x8f   :  { %180 = vsyncadd [#allocation4], 4294967264 }
  0x90   :  { %89 = vsyncpa [#allocation3], 1 }
  0x91   :  { %90 = vsyncpa [#allocation6], 1 }
  0x92   :  { %91 = vsyncpa [#allocation4], 1 }

</bundles_post_ra>
